<compile_context>
chip_gen: v7x
topology: tpu7x:2x2x1
jax: 0.10.0
libtpu: 0.0.40
codegen_flags: <defaults>
</compile_context>

<pallas_src>
import functools

import numpy as np
import jax
import jax.numpy as jnp
from jax.experimental import pallas as pl
from jax.experimental.pallas import tpu as pltpu

# Deterministic "parameters" from EdgeLoss.__init__ / CharbonnierLoss.
_K1D = (0.05, 0.25, 0.4, 0.25, 0.05)   # 5-tap binomial kernel
_EPS = 1e-3                            # Charbonnier eps
_MAX_BLOCK_ROWS = 512                  # cap on planes_per_step * H


# ---------------------------------------------------------------------------
# Trace-time construction of the Laplacian band operators.
# ---------------------------------------------------------------------------
def _blur_matrix(n):
    """n x n matrix of the 5-tap blur with replicate padding along one axis."""
    k = np.asarray(_K1D, dtype=np.float64)
    g = np.zeros((n, n), dtype=np.float64)
    for i in range(n):
        for t in range(5):
            j = min(max(i + t - 2, 0), n - 1)   # replicate-edge clamp
            g[i, j] += k[t]
    return g


def _lap_operators(h, w):
    """A_H, B_W such that laplacian(d) = d - A_H @ d @ B_W per (H, W) plane.

    blur(d)            = G_H @ d @ G_W^T
    4 * even-decimate  = (2 E_H) . (2 E_W)      (separable diagonal masks)
    blur(4*dec(blur))  = (G_H 2E_H G_H) @ d @ (G_W^T 2E_W G_W^T)
    """
    gh = _blur_matrix(h)
    gw = _blur_matrix(w)
    eh = np.diag((np.arange(h) % 2 == 0).astype(np.float64))
    ew = np.diag((np.arange(w) % 2 == 0).astype(np.float64))
    a_h = 2.0 * gh @ eh @ gh
    b_w = 2.0 * gw.T @ ew @ gw.T
    return a_h, b_w


def _pick_planes_per_step(nc, h):
    """Planes packed per grid step (divisor of nc, rows multiple of 8, capped)."""
    divs = [t for t in range(1, nc + 1) if nc % t == 0]
    good = [t for t in divs
            if (t * h) % 8 == 0 and t * h <= max(_MAX_BLOCK_ROWS, h)]
    if good:
        return max(good)
    aligned = [t for t in divs if (t * h) % 8 == 0]
    if aligned:
        return min(aligned)
    return nc   # single block: row count equals the full dim -> always legal


# ---------------------------------------------------------------------------
# Kernel: TP stacked (H, W) planes of (x - y) per grid step.
# ---------------------------------------------------------------------------
def _edge_loss_kernel(x_ref, y_ref, a_ref, b_ref, o_ref, *, eps_sq):
    # Linearity: laplacian(x) - laplacian(y) == laplacian(x - y).
    d = x_ref[...] - y_ref[...]                       # (rows, W) f32
    md = a_ref.dtype                                  # matmul dtype (bf16 default)

    # laplacian(d) = d - A_blk @ d @ B_W   (two MXU matmuls, f32 accumulation)
    t = jnp.dot(d.astype(md), b_ref[...],
                preferred_element_type=jnp.float32)   # column operator
    u = jnp.dot(a_ref[...], t.astype(md),
                preferred_element_type=jnp.float32)   # block-diag row operator
    lap = d - u

    # Per-block Charbonnier partial sum -> this step's own output block.
    partial = jnp.sum(jnp.sqrt(lap * lap + jnp.float32(eps_sq)))
    o_ref[...] = jnp.full(o_ref.shape, partial, jnp.float32)


def edge_loss(x, y, *, matmul_dtype=jnp.bfloat16):
    """EdgeLoss.forward(x, y) for NCHW tensors (f32 math, bf16 MXU operands)."""
    assert x.shape == y.shape and x.ndim == 4
    n, c, h, w = x.shape
    nc = n * c

    tp = _pick_planes_per_step(nc, h)     # planes stacked per step
    rows = tp * h
    num_blocks = nc // tp

    a_h, b_w = _lap_operators(h, w)
    a_blk = jnp.asarray(np.kron(np.eye(tp), a_h), matmul_dtype)   # (rows, rows)
    b_blk = jnp.asarray(b_w, matmul_dtype)                        # (w, w)

    # Host-side reshape is free (contiguous): planes stack along rows.
    x2 = x.astype(jnp.float32).reshape(nc * h, w)
    y2 = y.astype(jnp.float32).reshape(nc * h, w)

    op_bytes = jnp.dtype(matmul_dtype).itemsize
    vmem_need = (4 * rows * w * 4                         # x, y double-buffered
                 + 2 * (rows * rows + w * w) * op_bytes   # operators (2 bufs)
                 + 7 * rows * w * 4                       # live f32 temporaries
                 + 2 * 8 * 128 * 4)                       # output block
    vmem_limit = int(min(max(vmem_need + (4 << 20), 32 << 20), 100 << 20))

    cost = pl.CostEstimate(
        flops=int(2 * nc * h * w * (w + rows) + 6 * nc * h * w),
        transcendentals=int(nc * h * w),
        bytes_accessed=int(2 * nc * h * w * 4
                           + (rows * rows + w * w) * op_bytes
                           + num_blocks * 8 * 128 * 4),
    )

    kernel = functools.partial(_edge_loss_kernel, eps_sq=_EPS * _EPS)

    partials = pl.pallas_call(
        kernel,
        out_shape=jax.ShapeDtypeStruct((num_blocks, 8, 128), jnp.float32),
        grid=(num_blocks,),
        in_specs=[
            pl.BlockSpec((rows, w), lambda p: (p, 0)),      # x rows (pipelined)
            pl.BlockSpec((rows, w), lambda p: (p, 0)),      # y rows (pipelined)
            pl.BlockSpec((rows, rows), lambda p: (0, 0)),   # A_blk (constant index)
            pl.BlockSpec((w, w), lambda p: (0, 0)),         # B_W   (constant index)
        ],
        out_specs=pl.BlockSpec((1, 8, 128), lambda p: (p, 0, 0)),
        compiler_params=pltpu.CompilerParams(
            # Each step is independent (writes its own output block) -> parallel
            # grid; uses both TensorCores on v7x, harmless on v5e/v6e.
            dimension_semantics=("parallel",),
            vmem_limit_bytes=vmem_limit,
        ),
        cost_estimate=cost,
    )(x2, y2, a_blk, b_blk)

    total = jnp.sum(partials[:, 0, 0])
    return total * jnp.float32(1.0 / float(n * c * h * w))


# ---------------- pure-JAX reference (mirrors the PyTorch module) -----------
def _ref_conv_gauss(img):
    k1 = jnp.array(_K1D, jnp.float32)
    k2 = jnp.outer(k1, k1)
    H, W = img.shape[2], img.shape[3]
    p = jnp.pad(img, ((0, 0), (0, 0), (2, 2), (2, 2)), mode="edge")
    out = jnp.zeros_like(img)
    for a in range(5):
        for b in range(5):
            out = out + k2[a, b] * p[:, :, a:a + H, b:b + W]
    return out


def _ref_laplacian(cur):
    filtered = _ref_conv_gauss(cur)
    down = filtered[:, :, ::2, ::2]
    new_filter = jnp.zeros_like(filtered)
    new_filter = new_filter.at[:, :, ::2, ::2].set(down * 4.0)
    filtered = _ref_conv_gauss(new_filter)
    return cur - filtered


def _ref_edge_loss(x, y):
    diff = _ref_laplacian(x) - _ref_laplacian(y)
    return jnp.mean(jnp.sqrt(diff * diff + _EPS * _EPS))


if __name__ == "__main__":
    key = jax.random.PRNGKey(0)
    kx, ky = jax.random.split(key)
    # 3 channels, NCHW — matches the module's depthwise 3-channel kernel.
    x = jax.random.normal(kx, (2, 3, 16, 16), dtype=jnp.float32)
    y = jax.random.normal(ky, (2, 3, 16, 16), dtype=jnp.float32)

    loss = edge_loss(x, y)
    jax.block_until_ready(loss)

    ref = _ref_edge_loss(x, y)
    # bf16 MXU operands (f32 accumulation) introduce ~1e-4-level rounding in the
    # pyramid operator; use matmul_dtype=jnp.float32 for bit-tight agreement.
    if not jnp.allclose(loss, ref, atol=1e-3, rtol=1e-3):
        raise AssertionError(f"mismatch: kernel={loss} ref={ref}")

    print("KERNEL_OK")
</pallas_src>

<mosaic_0001>
module attributes {stable_mosaic.version = 11 : i64} {
  func.func @_edge_loss_kernel(%arg0: i32, %arg1: memref<96x16xf32, #tpu.memory_space<vmem>>, %arg2: memref<96x16xf32, #tpu.memory_space<vmem>>, %arg3: memref<96x96xbf16, #tpu.memory_space<vmem>>, %arg4: memref<16x16xbf16, #tpu.memory_space<vmem>>, %arg5: memref<1x8x128xf32, #tpu.memory_space<vmem>>) attributes {dimension_semantics = [#tpu.dimension_semantics<parallel>], iteration_bounds = array<i64: 1>, scalar_prefetch = 0 : i64, scratch_operands = 0 : i64, tpu.core_type = #tpu.core_type<tc>, window_params = [{transform_indices = @transform_0, window_bounds = array<i64: 96, 16>}, {transform_indices = @transform_1, window_bounds = array<i64: 96, 16>}, {pipeline_mode = #tpu.pipeline_mode<synchronous>, transform_indices = @transform_2, window_bounds = array<i64: 96, 96>}, {pipeline_mode = #tpu.pipeline_mode<synchronous>, transform_indices = @transform_3, window_bounds = array<i64: 16, 16>}, {transform_indices = @transform_4, window_bounds = array<i64: 1, 8, 128>}]} {
    %c0 = arith.constant 0 : index
    %c0_0 = arith.constant 0 : index
    %0 = vector.load %arg1[%c0, %c0_0] : memref<96x16xf32, #tpu.memory_space<vmem>>, vector<96x16xf32>
    %c0_1 = arith.constant 0 : index
    %c0_2 = arith.constant 0 : index
    %1 = vector.load %arg2[%c0_1, %c0_2] : memref<96x16xf32, #tpu.memory_space<vmem>>, vector<96x16xf32>
    %2 = arith.subf %0, %1 : vector<96x16xf32>
    %3 = arith.truncf %2 : vector<96x16xf32> to vector<96x16xbf16>
    %c0_3 = arith.constant 0 : index
    %c0_4 = arith.constant 0 : index
    %4 = vector.load %arg4[%c0_3, %c0_4] : memref<16x16xbf16, #tpu.memory_space<vmem>>, vector<16x16xbf16>
    %cst = arith.constant dense<0.000000e+00> : vector<96x16xf32>
    %5 = tpu.matmul %3, %4, %cst {dimension_numbers = #tpu.dot_dimension_numbers<[1], [0], [0], [1], [0, 0, 1, 1], [], []>} : vector<96x16xbf16>, vector<16x16xbf16>, vector<96x16xf32> -> vector<96x16xf32>
    %c0_5 = arith.constant 0 : index
    %c0_6 = arith.constant 0 : index
    %6 = vector.load %arg3[%c0_5, %c0_6] : memref<96x96xbf16, #tpu.memory_space<vmem>>, vector<96x96xbf16>
    %7 = arith.truncf %5 : vector<96x16xf32> to vector<96x16xbf16>
    %cst_7 = arith.constant dense<0.000000e+00> : vector<96x16xf32>
    %8 = tpu.matmul %6, %7, %cst_7 {dimension_numbers = #tpu.dot_dimension_numbers<[1], [0], [0], [1], [0, 0, 1, 1], [], []>} : vector<96x96xbf16>, vector<96x16xbf16>, vector<96x16xf32> -> vector<96x16xf32>
    %9 = arith.subf %2, %8 : vector<96x16xf32>
    %10 = arith.mulf %9, %9 : vector<96x16xf32>
    %cst_8 = arith.constant 9.99999997E-7 : f32
    %11 = vector.broadcast %cst_8 : f32 to vector<96x16xf32>
    %12 = arith.addf %10, %11 : vector<96x16xf32>
    %13 = math.sqrt %12 : vector<96x16xf32>
    %14 = vector.shape_cast %13 : vector<96x16xf32> to vector<1x96x16xf32>
    %cst_9 = arith.constant dense<0.000000e+00> : vector<1xf32>
    %15 = vector.multi_reduction <add>, %14, %cst_9 [1, 2] : vector<1x96x16xf32> to vector<1xf32>
    %16 = vector.shape_cast %15 : vector<1xf32> to vector<1x1x1xf32>
    %17 = vector.extract %16[0, 0, 0] : f32 from vector<1x1x1xf32>
    %18 = vector.broadcast %17 : f32 to vector<1x8x128xf32>
    %c0_10 = arith.constant 0 : index
    %c0_11 = arith.constant 0 : index
    %c0_12 = arith.constant 0 : index
    %19 = vector.load %arg5[%c0_10, %c0_11, %c0_12] : memref<1x8x128xf32, #tpu.memory_space<vmem>>, vector<1x8x128xf32>
    tpu.vector_store %arg5[%c0_10, %c0_11, %c0_12], %18 {strides = array<i32>} : memref<1x8x128xf32, #tpu.memory_space<vmem>>, vector<1x8x128xf32>,
    return
  }
  func.func @transform_0(%arg0: i32) -> (i32, i32) {
    %c0_i32 = arith.constant 0 : i32
    %c0_i32_0 = arith.constant 0 : i32
    return %arg0, %c0_i32 : i32, i32
  }
  func.func @transform_1(%arg0: i32) -> (i32, i32) {
    %c0_i32 = arith.constant 0 : i32
    %c0_i32_0 = arith.constant 0 : i32
    return %arg0, %c0_i32 : i32, i32
  }
  func.func @transform_2(%arg0: i32) -> (i32, i32) {
    %c0_i32 = arith.constant 0 : i32
    %c0_i32_0 = arith.constant 0 : i32
    %c0_i32_1 = arith.constant 0 : i32
    return %c0_i32, %c0_i32_0 : i32, i32
  }
  func.func @transform_3(%arg0: i32) -> (i32, i32) {
    %c0_i32 = arith.constant 0 : i32
    %c0_i32_0 = arith.constant 0 : i32
    %c0_i32_1 = arith.constant 0 : i32
    return %c0_i32, %c0_i32_0 : i32, i32
  }
  func.func @transform_4(%arg0: i32) -> (i32, i32, i32) {
    %c0_i32 = arith.constant 0 : i32
    %c0_i32_0 = arith.constant 0 : i32
    %c0_i32_1 = arith.constant 0 : i32
    return %arg0, %c0_i32, %c0_i32_0 : i32, i32, i32
  }
}

</mosaic_0001>

<bundles_post_ra>
// kernel: tpu_custom_call.1
= control target key start
LH: loop header
LB: loop body
LE: loop exit
PB: predicated region body
PF: predicated region fallthrough
CT: control target
= control target key end

     0   :  { %vm69_vm0 = vcmask 130048   ;;  %s922_s0 = inlined_call_operand.vmem [shape: f32[96,16], index: 0, kind: input, shape index: {}]   ;;  %s923_s1 = inlined_call_operand.vmem [shape: f32[96,16], index: 1, kind: input, shape index: {}]   ;;  %s924_s2 = inlined_call_operand.vmem [shape: bf16[96,96], index: 2, kind: input, shape index: {}]   ;;  %s925_s3 = inlined_call_operand.vmem [shape: bf16[16,16], index: 3, kind: input, shape index: {}]   ;;  %s926_s4 = inlined_call_operand.hbm [shape: f32[1,8,128], index: 4, kind: output, shape index: {}]  }
   0x1   :  { %v576_v0 = vld [vmem:[%s925_s3] sm:$0xff]   ;;  %v20_v2 = vld [vmem:[%s922_s0 + $0x8] sm:$0xff]  ;;  %v21_v6 = vld [vmem:[%s922_s0 + $0x10] sm:$0xff] }
   0x2   :  { %v19_v1 = vld [vmem:[%s922_s0] sm:$0xff]  ;;  %523 = vmatprep.subr.bf16.mxu0 %v576_v0  ;;  %v32_v4 = vld [vmem:[%s923_s1 + $0x8] sm:$0xff]  ;;  %v22_v7 = vld [vmem:[%s922_s0 + $0x18] sm:$0xff] }
   0x3   :  { %v31_v3 = vld [vmem:[%s923_s1] sm:$0xff]  ;;  %524 = vmatpush3.bf16.msra.mxu0 %v576_v0  ;;  %v680_v8 = vsub.f32 %v20_v2, %v32_v4  ;;  %v33_v9 = vld [vmem:[%s923_s1 + $0x10] sm:$0xff]  ;;  %v34_v10 = vld [vmem:[%s923_s1 + $0x18] sm:$0xff] }
   0x4   :  { %v672_v5 = vsub.f32 %v19_v1, %v31_v3  ;;  %v23_v11 = vld [vmem:[%s922_s0 + $0x20] sm:$0xff]  ;;  %v691_v12 = vsub.f32 %v21_v6, %v33_v9  ;;  %v693_v13 = vsub.f32 %v22_v7, %v34_v10  ;;  %v24_v14 = vld [vmem:[%s922_s0 + $0x28] sm:$0xff]  ;;  %v25_v20 = vld [vmem:[%s922_s0 + $0x30] sm:$0xff] }
   0x5   :  { %v35_v15 = vld [vmem:[%s923_s1 + $0x20] sm:$0xff]  ;;  %v36_v16 = vld [vmem:[%s923_s1 + $0x28] sm:$0xff]  ;;  %v26_v21 = vld [vmem:[%s922_s0 + $0x38] sm:$0xff] }
   0x6   :  { %v55_v17 = vpack.c.bf16 %v680_v8, %v672_v5  ;;  %v706_v18 = vsub.f32 %v23_v11, %v35_v15  ;;  %v708_v19 = vsub.f32 %v24_v14, %v36_v16  ;;  %v37_v22 = vld [vmem:[%s923_s1 + $0x30] sm:$0xff]  ;;  %v56_v23 = vpack.c.bf16 %v693_v13, %v691_v12  ;;  %v38_v24 = vld [vmem:[%s923_s1 + $0x38] sm:$0xff]  ;;  %v27_v25 = vld [vmem:[%s922_s0 + $0x40] sm:$0xff] }
   0x7   :  { %v28_v26 = vld [vmem:[%s922_s0 + $0x48] sm:$0xff]  ;;  %v39_v28 = vld [vmem:[%s923_s1 + $0x40] sm:$0xff]  ;;  %v740_v30 = vsub.f32 %v25_v20, %v37_v22  ;;  %v742_v31 = vsub.f32 %v26_v21, %v38_v24  ;;  %v29_v34 = vld [vmem:[%s922_s0 + $0x50] sm:$0xff] }
   0x8   :  { %525 = vmatprep.mubr.msk.bf16.mxu0 %vm69_vm0, %v55_v17  ;;  %v57_v27 = vpack.c.bf16 %v708_v19, %v706_v18  ;;  %v40_v29 = vld [vmem:[%s923_s1 + $0x48] sm:$0xff]  ;;  %v745_v32 = vsub.f32 %v27_v25, %v39_v28  ;;  %v30_v35 = vld [vmem:[%s922_s0 + $0x58] sm:$0xff]  ;;  %v41_v38 = vld [vmem:[%s923_s1 + $0x50] sm:$0xff] }
   0x9   :  { %526 = vmatmul.mubr.msk.bf16.vlgmr.msra.gmra.mrb[0].mxu0 %vm69_vm0, %v56_v23  ;;  %v747_v33 = vsub.f32 %v28_v26, %v40_v29  ;;  %v58_v36 = vpack.c.bf16 %v742_v31, %v740_v30  ;;  %v42_v39 = vld [vmem:[%s923_s1 + $0x58] sm:$0xff] }
   0xa   :  { %529 = vmatprep.mubr.msk.bf16.mxu0 %vm69_vm0, %v57_v27 }
   0xb   :  { %v59_v37 = vpack.c.bf16 %v747_v33, %v745_v32 }
   0xc   :  { %9 = vsyncpa [#allocation3], 0  ;;  %v766_v40 = vsub.f32 %v29_v34, %v41_v38  ;;  %v768_v41 = vsub.f32 %v30_v35, %v42_v39  ;;  %v577_v43 = vld [vmem:[%s924_s2] sm:$0xff]   ;;  %vm217_vm1 = vcmask 785408   ;;  %v578_v44 = vld [vmem:[%s924_s2 + $0x10] sm:$0xff]  }
   0xd   :  { %553 = vmatprep.mubr.msk.bf16.mxu1 %vm217_vm1, %v578_v44  ;;  %v579_v63 = vld [vmem:[%s924_s2 + $0x8] sm:$0xff]   ;;  %v580_v0 = vld [vmem:[%s924_s2 + $0x18] sm:$0xff]   ;;  %v581_v1 = vld [vmem:[%s924_s2 + $0x20] sm:$0xff]  }
   0xe   :  { %v60_v42 = vpack.c.bf16 %v768_v41, %v766_v40  ;;  %v582_v2 = vld [vmem:[%s924_s2 + $0x28] sm:$0xff]   ;;  %s631_s2 = smov [#allocation2]  }
   0xf   :  { %s477_s21 = sshll.u32 %s631_s2, 4  ;;  %s478_s21 = int_to_ptr.vmem [resolvable:$true] %s477_s21 }
  0x10   :  { %s607_s23 = scalar_lea.vmem %s478_s21, 128  ;;  %p612_p1 = scmp.lt.s32.totalorder %s478_s21, %s478_s21 }
  0x11   :  { %530 = vmatmul.mubr.msk.bf16.gmra.mrb[4].mxu0 %vm69_vm0, %v58_v36  ;;  %p608_p0 = scmp.ne.s32.totalorder %s478_s21, %s607_s23  ;;  %p613_p2 = scmp.lt.s32.totalorder %s607_s23, %s607_s23 }
  0x12   :  { %533 = vmatprep.mubr.msk.bf16.mxu0 %vm69_vm0, %v59_v37 }
  0x13   :  { %p614_p3 = por %p613_p2, %p612_p1 }
  0x15   :  { %p615_p4 = pnand %p614_p3, %p608_p0 }
  0x19   :  { %534 = vmatmul.mubr.msk.bf16.gmra.mrb[8].mxu0 %vm69_vm0, %v60_v42 }
  0x1a   :  { %549 = vmatprep.mubr.msk.bf16.mxu0 %vm217_vm1, %v577_v43 }
  0xdc   :  { %v527_v45 = vpop.f32.mrb[0].mxu0 }
  0xdd   :  { %v122_v46 = vpop.f32.mrb[1].mxu0 }
  0xde   :  { %v528_v47 = vpop.f32.mrb[2].mxu0 }
  0xdf   :  { %v182_v48 = vpack.c.bf16 %v528_v47, %v527_v45  ;;  %v125_v49 = vpop.f32.mrb[3].mxu0 }
  0xe0   :  { %v181_v50 = vpack.c.bf16 %v125_v49, %v122_v46 }
  0xe2   :  { %537 = vmatprep.subr.bf16.mxu0 %v181_v50  ;;  %561 = vmatprep.subr.bf16.mxu1 %v181_v50 }
  0xe3   :  { %538 = vmatpush3.bf16.msra.mxu0 %v181_v50  ;;  %567 = vmatpush3.bf16.msra.mxu1 %v181_v50 }
  0xe4   :  { %v531_v51 = vpop.f32.mrb[4].mxu0  ;;  %539 = vmatprep.subr.bf16.mxu0 %v182_v48  ;;  %562 = vmatprep.subr.bf16.mxu1 %v182_v48 }
  0xe5   :  { %v138_v52 = vpop.f32.mrb[5].mxu0 }
  0xe6   :  { %v532_v53 = vpop.f32.mrb[6].mxu0 }
  0xe7   :  { %v184_v54 = vpack.c.bf16 %v532_v53, %v531_v51  ;;  %v141_v55 = vpop.f32.mrb[7].mxu0  ;;  %540 = vmatpush3.bf16.msra.mxu0 %v182_v48  ;;  %568 = vmatpush3.bf16.msra.mxu1 %v182_v48 }
  0xe8   :  { %v183_v56 = vpack.c.bf16 %v141_v55, %v138_v52 }
  0xea   :  { %541 = vmatprep.subr.bf16.mxu0 %v183_v56  ;;  %563 = vmatprep.subr.bf16.mxu1 %v183_v56 }
  0xeb   :  { %542 = vmatpush3.bf16.msra.mxu0 %v183_v56  ;;  %569 = vmatpush3.bf16.msra.mxu1 %v183_v56 }
  0xec   :  { %v535_v57 = vpop.f32.mrb[8].mxu0  ;;  %543 = vmatprep.subr.bf16.mxu0 %v184_v54  ;;  %564 = vmatprep.subr.bf16.mxu1 %v184_v54 }
  0xed   :  { %v154_v58 = vpop.f32.mrb[9].mxu0 }
  0xee   :  { %v536_v59 = vpop.f32.mrb[10].mxu0 }
  0xef   :  { %v186_v60 = vpack.c.bf16 %v536_v59, %v535_v57  ;;  %v157_v61 = vpop.f32.mrb[11].mxu0  ;;  %544 = vmatpush3.bf16.msra.mxu0 %v184_v54  ;;  %570 = vmatpush3.bf16.msra.mxu1 %v184_v54 }
  0xf0   :  { %v185_v62 = vpack.c.bf16 %v157_v61, %v154_v58 }
  0xf2   :  { %545 = vmatprep.subr.bf16.mxu0 %v185_v62  ;;  %565 = vmatprep.subr.bf16.mxu1 %v185_v62 }
  0xf3   :  { %546 = vmatpush3.bf16.msra.mxu0 %v185_v62  ;;  %571 = vmatpush3.bf16.msra.mxu1 %v185_v62 }
  0xf4   :  { %547 = vmatprep.subr.bf16.mxu0 %v186_v60  ;;  %566 = vmatprep.subr.bf16.mxu1 %v186_v60 }
  0xf7   :  { %548 = vmatpush3.bf16.msra.mxu0 %v186_v60  ;;  %572 = vmatpush3.bf16.msra.mxu1 %v186_v60 }
  0xfa   :  { %550 = vmatmul.mubr.msk.bf16.vlgmr.msra.gmra.mrb[12].mxu0 %vm217_vm1, %v579_v63  ;;  %554 = vmatmul.mubr.msk.bf16.vlgmr.msra.gmra.mrb[0].mxu1 %vm217_vm1, %v580_v0 }
  0xfb   :  { %557 = vmatprep.mubr.msk.bf16.mxu1 %vm217_vm1, %v581_v1 }
 0x102   :  { %558 = vmatmul.mubr.msk.bf16.gmra.mrb[4].mxu1 %vm217_vm1, %v582_v2 }
 0x1cd   :  { %v551_v3 = vpop.f32.mrb[12].mxu0  ;;  %v555_v4 = vpop.f32.mrb[0].mxu1 }
 0x1ce   :  { %v319_v6 = vsub.f32 %v691_v12, %v551_v3  ;;  %v270_v7 = vpop.f32.mrb[13].mxu0  ;;  %v286_v9 = vpop.f32.mrb[1].mxu1  ;;  %v323_v17 = vsub.f32 %v740_v30, %v555_v4 }
 0x1cf   :  { %v317_v10 = vsub.f32 %v672_v5, %v270_v7  ;;  %v321_v11 = vsub.f32 %v706_v18, %v286_v9  ;;  %v552_v14 = vpop.f32.mrb[14].mxu0  ;;  %v556_v15 = vpop.f32.mrb[2].mxu1 }
 0x1d0   :  { %v331_v16 = vmul.f32 %v319_v6, %v319_v6  ;;  %v320_v20 = vsub.f32 %v693_v13, %v552_v14  ;;  %v273_v21 = vpop.f32.mrb[15].mxu0  ;;  %v289_v22 = vpop.f32.mrb[3].mxu1  ;;  %v324_v18 = vsub.f32 %v742_v31, %v556_v15  ;;  %v335_v13 = vmul.f32 %v323_v17, %v323_v17 }
 0x1d1   :  { %v329_v23 = vmul.f32 %v317_v10, %v317_v10  ;;  %v333_v24 = vmul.f32 %v321_v11, %v321_v11  ;;  %v318_v25 = vsub.f32 %v680_v8, %v273_v21  ;;  %v322_v12 = vsub.f32 %v708_v19, %v289_v22 }
 0x1d2   :  { %v805_v26 = vadd.f32 1e-06, %v331_v16  ;;  %v332_v5 = vmul.f32 %v320_v20, %v320_v20  ;;  %v336_v35 = vmul.f32 %v324_v18, %v324_v18  ;;  %v819_v38 = vadd.f32 1e-06, %v335_v13 }
 0x1d3   :  { %v807_v27 = vadd.f32 1e-06, %v329_v23  ;;  %v330_v28 = vmul.f32 %v318_v25, %v318_v25  ;;  %v334_v29 = vmul.f32 %v322_v12, %v322_v12  ;;  %v811_v30 = vadd.f32 1e-06, %v333_v24 }
 0x1d4   :  { %583 = vrsqrt.f32 %v805_v26  ;;  %v814_v8 = vadd.f32 1e-06, %v332_v5  ;;  %v824_v44 = vadd.f32 1e-06, %v336_v35  ;;  %vm369_vm2 = vcmp.eq.f32.partialorder %v805_v26, inf }
 0x1d5   :  { %v559_v34 = vpop.f32.mrb[4].mxu1  ;;  %585 = vrsqrt.f32 %v807_v27  ;;  %v342_v36 = vadd.f32 1e-06, %v330_v28  ;;  %v816_v37 = vadd.f32 1e-06, %v334_v29  ;;  %vm355_vm3 = vcmp.eq.f32.partialorder %v807_v27, inf }
 0x1d6   :  { %v302_v19 = vpop.f32.mrb[5].mxu1  ;;  %587 = vrsqrt.f32 %v814_v8  ;;  %v327_v42 = vsub.f32 %v766_v40, %v559_v34  ;;  %v372_v58 = vand.u32 2147483648, %v805_v26  ;;  %vm357_vm4 = vcmp.eq.f32.partialorder %v807_v27, 0.0 }
 0x1d7   :  { %v560_v31 = vpop.f32.mrb[6].mxu1  ;;  %589 = vrsqrt.f32 %v811_v30  ;;  %v325_v43 = vsub.f32 %v745_v32, %v302_v19  ;;  %v358_v62 = vand.u32 2147483648, %v807_v27  ;;  %vm376_vm5 = vcmp.eq.f32.partialorder %v814_v8, inf }
 0x1d8   :  { %v305_v39 = vpop.f32.mrb[7].mxu1  ;;  %591 = vrsqrt.f32 %v342_v36  ;;  %v328_v45 = vsub.f32 %v768_v41, %v560_v31  ;;  %v339_v48 = vmul.f32 %v327_v42, %v327_v42  ;;  %vm362_vm6 = vcmp.eq.f32.partialorder %v342_v36, inf }
 0x1d9   :  { %593 = vrsqrt.f32 %v816_v37  ;;  %v326_v46 = vsub.f32 %v747_v33, %v305_v39  ;;  %v337_v47 = vmul.f32 %v325_v43, %v325_v43  ;;  %v365_v2 = vand.u32 2147483648, %v342_v36 }
 0x1da   :  { %595 = vrsqrt.f32 %v819_v38  ;;  %v340_v40 = vmul.f32 %v328_v45, %v328_v45  ;;  %v836_v54 = vadd.f32 1e-06, %v339_v48  ;;  %vm364_vm7 = vcmp.eq.f32.partialorder %v342_v36, 0.0 }
 0x1db   :  { %v338_v49 = vmul.f32 %v326_v46, %v326_v46  ;;  %v830_v50 = vadd.f32 1e-06, %v337_v47  ;;  %597 = vrsqrt.f32 %v824_v44  ;;  %vm371_vm8 = vcmp.eq.f32.partialorder %v805_v26, 0.0 }
 0x1dc   :  { %v842_v56 = vadd.f32 1e-06, %v340_v40  ;;  %vm383_vm9 = vcmp.eq.f32.partialorder %v811_v30, inf  ;;  %vm378_vm10 = vcmp.eq.f32.partialorder %v814_v8, 0.0  ;;  %v379_v14 = vand.u32 2147483648, %v814_v8 }
 0x1dd   :  { %v833_v32 = vadd.f32 1e-06, %v338_v49  ;;  %599 = vrsqrt.f32 %v830_v50  ;;  %v386_v23 = vand.u32 2147483648, %v811_v30  ;;  %vm390_vm11 = vcmp.eq.f32.partialorder %v816_v37, inf }
 0x1de   :  { %v584_v51 = vpop.eup %583  ;;  %vm385_vm12 = vcmp.eq.f32.partialorder %v811_v30, 0.0  ;;  %v393_v28 = vand.u32 2147483648, %v816_v37  ;;  %vm397_vm13 = vcmp.eq.f32.partialorder %v819_v38, inf  ;;  %vm392_vm14 = vcmp.eq.f32.partialorder %v816_v37, 0.0 }
 0x1df   :  { %v586_v52 = vpop.eup %585  ;;  %v368_v41 = vmul.f32 %v584_v51, %v805_v26  ;;  %601 = vrsqrt.f32 %v833_v32  ;;  %v400_v35 = vand.u32 2147483648, %v819_v38  ;;  %vm404_vm15 = vcmp.eq.f32.partialorder %v824_v44, inf }
 0x1e0   :  { %v354_v53 = vmul.f32 %v586_v52, %v807_v27  ;;  %v588_v33 = vpop.eup %587  ;;  %603 = vrsqrt.f32 %v836_v54  ;;  %vm399_vm1 = vcmp.eq.f32.partialorder %v819_v38, 0.0  ;;  %v407_v45 = vand.u32 2147483648, %v824_v44 }
 0x1e1   :  { %v590_v55 = vpop.eup %589  ;;  %v375_v60 = vmul.f32 %v588_v33, %v814_v8  ;;  %v370_v0 = vsel %vm369_vm2, %v805_v26, %v368_v41  ;;  %605 = vrsqrt.f32 %v842_v56  ;;  %vm411_vm2 = vcmp.eq.f32.partialorder %v830_v50, inf }
 0x1e2   :  { %v592_v57 = vpop.eup %591  ;;  %v356_v59 = vsel %vm355_vm3, %v807_v27, %v354_v53  ;;  %v382_v1 = vmul.f32 %v590_v55, %v811_v30  ;;  %v373_v15 = vsel %vm371_vm8, %v372_v58, %v370_v0  ;;  %vm406_vm3 = vcmp.eq.f32.partialorder %v824_v44, 0.0 }
 0x1e3   :  { %v594_v61 = vpop.eup %593  ;;  %v361_v63 = vmul.f32 %v592_v57, %v342_v36  ;;  %v359_v4 = vsel %vm357_vm4, %v358_v62, %v356_v59  ;;  %v377_v7 = vsel %vm376_vm5, %v814_v8, %v375_v60  ;;  %v440_v5 = vsel %vm69_vm0, %v373_v15, 0.0 }
 0x1e4   :  { %v596_v3 = vpop.eup %595  ;;  %v389_v10 = vmul.f32 %v594_v61, %v816_v37  ;;  %v384_v16 = vsel %vm383_vm9, %v811_v30, %v382_v1  ;;  %v437_v20 = vsel %vm69_vm0, %v359_v4, 0.0  ;;  %v380_v24 = vsel %vm378_vm10, %v379_v14, %v377_v7 }
 0x1e5   :  { %v363_v6 = vsel %vm362_vm6, %v342_v36, %v361_v63  ;;  %v598_v11 = vpop.eup %597  ;;  %v396_v17 = vmul.f32 %v596_v3, %v819_v38  ;;  %v387_v18 = vsel %vm385_vm12, %v386_v23, %v384_v16  ;;  %v442_v30 = vsel %vm69_vm0, %v380_v24, 0.0 }
 0x1e6   :  { %v366_v9 = vsel %vm364_vm7, %v365_v2, %v363_v6  ;;  %v391_v12 = vsel %vm390_vm11, %v816_v37, %v389_v10  ;;  %v403_v26 = vmul.f32 %v598_v11, %v824_v44  ;;  %v444_v37 = vsel %vm69_vm0, %v387_v18, 0.0 }
 0x1e7   :  { %v438_v21 = vsel %vm69_vm0, %v366_v9, 0.0  ;;  %v600_v22 = vpop.eup %599  ;;  %v398_v13 = vsel %vm397_vm13, %v819_v38, %v396_v17  ;;  %v394_v19 = vsel %vm392_vm14, %v393_v28, %v391_v12  ;;  %v414_v51 = vand.u32 2147483648, %v830_v50 }
 0x1e8   :  { %v439_v25 = vadd.f32 %v438_v21, %v437_v20  ;;  %v410_v34 = vmul.f32 %v600_v22, %v830_v50  ;;  %v405_v31 = vsel %vm404_vm15, %v824_v44, %v403_v26  ;;  %v401_v43 = vsel %vm399_vm1, %v400_v35, %v398_v13 }
 0x1e9   :  { %v602_v27 = vpop.eup %601  ;;  %v446_v38 = vsel %vm69_vm0, %v394_v19, 0.0  ;;  %v408_v49 = vsel %vm406_vm3, %v407_v45, %v405_v31  ;;  %vm418_vm4 = vcmp.eq.f32.partialorder %v833_v32, inf  ;;  %vm413_vm5 = vcmp.eq.f32.partialorder %v830_v50, 0.0 }
 0x1ea   :  { %v441_v29 = vadd.f32 %v440_v5, %v439_v25  ;;  %v604_v8 = vpop.eup %603  ;;  %v417_v39 = vmul.f32 %v602_v27, %v833_v32  ;;  %v412_v47 = vsel %vm411_vm2, %v830_v50, %v410_v34  ;;  %v448_v44 = vsel %vm69_vm0, %v401_v43, 0.0 }
 0x1eb   :  { %v606_v42 = vpop.eup %605  ;;  %v424_v48 = vmul.f32 %v604_v8, %v836_v54  ;;  %v415_v33 = vsel %vm413_vm5, %v414_v51, %v412_v47  ;;  %v421_v41 = vand.u32 2147483648, %v833_v32  ;;  %vm425_vm6 = vcmp.eq.f32.partialorder %v836_v54, inf }
 0x1ec   :  { %v443_v36 = vadd.f32 %v442_v30, %v441_v29  ;;  %v419_v52 = vsel %vm418_vm4, %v833_v32, %v417_v39  ;;  %v431_v53 = vmul.f32 %v606_v42, %v842_v56  ;;  %vm420_vm7 = vcmp.eq.f32.partialorder %v833_v32, 0.0 }
 0x1ed   :  { %v426_v57 = vsel %vm425_vm6, %v836_v54, %v424_v48  ;;  %v450_v58 = vsel %vm69_vm0, %v408_v49, 0.0  ;;  %v422_v59 = vsel %vm420_vm7, %v421_v41, %v419_v52  ;;  %v428_v50 = vand.u32 2147483648, %v836_v54 }
 0x1ee   :  { %v445_v46 = vadd.f32 %v444_v37, %v443_v36  ;;  %vm432_vm8 = vcmp.eq.f32.partialorder %v842_v56, inf  ;;  %vm427_vm9 = vcmp.eq.f32.partialorder %v836_v54, 0.0  ;;  %v452_v62 = vsel %vm69_vm0, %v415_v33, 0.0 }
 0x1ef   :  { %v433_v61 = vsel %vm432_vm8, %v842_v56, %v431_v53  ;;  %v429_v63 = vsel %vm427_vm9, %v428_v50, %v426_v57  ;;  %v435_v0 = vand.u32 2147483648, %v842_v56  ;;  %vm434_vm10 = vcmp.eq.f32.partialorder %v842_v56, 0.0 }
 0x1f0   :  { %v447_v40 = vadd.f32 %v446_v38, %v445_v46  ;;  %v454_v1 = vsel %vm69_vm0, %v422_v59, 0.0  ;;  %v456_v4 = vsel %vm69_vm0, %v429_v63, 0.0 }
 0x1f1   :  { %v436_v2 = vsel %vm434_vm10, %v435_v0, %v433_v61 }
 0x1f2   :  { %v449_v55 = vadd.f32 %v448_v44, %v447_v40  ;;  %v458_v7 = vsel %vm69_vm0, %v436_v2, 0.0 }
 0x1f4   :  { %v451_v60 = vadd.f32 %v450_v58, %v449_v55 }
 0x1f6   :  { %v453_v32 = vadd.f32 %v452_v62, %v451_v60 }
 0x1f8   :  { %v455_v3 = vadd.f32 %v454_v1, %v453_v32 }
 0x1fa   :  { %v457_v6 = vadd.f32 %v456_v4, %v455_v3 }
 0x1fc   :  { %v459_v54 = vadd.f32 %v458_v7, %v457_v6 }
 0x1fe   :  { %460 = vadd.xlane.f32.xlu0 %v459_v54 }
 0x28b   :  { %v461_v9 = vpop.xlane.xlu0 %460 }
 0x28c   :  { %v462_v10 = vrot.slane %v461_v9, 4 }
 0x28e   :  { %v463_v11 = vadd.f32 %v462_v10, %v461_v9 }
 0x290   :  { %v464_v14 = vrot.slane %v463_v11, 2 }
 0x292   :  { %v465_v15 = vadd.f32 %v464_v14, %v463_v11 }
 0x294   :  { %v466_v16 = vrot.slane %v465_v15, 1 }
 0x296   :  { %v467_v17 = vadd.f32 %v466_v16, %v465_v15 }
 0x298   :  { %573 = vpush %v467_v17 }
 0x2c9   :  { %s574_s22 = spop %573 }
 0x2ca   :  { %v469_v56 = vstv %s574_s22 }
 0x2cb   :  { %470 = vst [vmem:[#allocation2] sm:$0xff] %v469_v56 }
 0x2cc   :  { %618 = shalt.err (!%p615_p4)
}
 0x2cd   :  { %s619_s25 = scalar_lea.hbm %s926_s4, 128 }
 0x2ce   :  { %p620_p5 = scmp.ne.s32.totalorder %s926_s4, %s619_s25  ;;  %p623_p6 = scmp.lt.u32.totalorder %s619_s25, %s926_s4 }
 0x2d0   :  { %p625_p7 = pnand %p623_p6, %p620_p5 }
 0x2d2   :  { %628 = shalt.err (!%p625_p7)
}
 0x2d3   :  { %480 = dma.vmem_to_hbm [thread:$0]  %s478_s21, 128, %s926_s4, [#allocation3]  }
 0x2d4   :  { %629 = dma.done.wait [#allocation3], 128  }
 0x2d5   :  { %630 = vsyncadd [#allocation3], 4294967168 }
 0x2d6   :  { %484 = vsyncpa [#allocation3], 1 }

</bundles_post_ra>
